<compile_context>
chip_gen: v5e
topology: v5e:2x2
jax: 0.10.0
libtpu: 0.0.40
codegen_flags: <defaults>
</compile_context>

<pallas_src>
import jax
import jax.numpy as jnp
from jax import lax
from jax.experimental import pallas as pl
from jax.experimental.pallas import tpu as pltpu

LEAKINESS = 0.1   # NodeModel default leakiness passed to nn.LeakyReLU
BN_EPS = 1e-5     # nn.BatchNorm1d default


def _bn_norm(v):
    # training-mode BatchNorm1d WITHOUT affine (gamma/beta folded into next Linear):
    # batch mean + biased variance over rows, reusing (v - mean).
    mean = jnp.mean(v, axis=0, keepdims=True)
    c = v - mean
    var = jnp.mean(c * c, axis=0, keepdims=True)
    return c * lax.rsqrt(var + BN_EPS)


def _leaky_relu(v):
    return jnp.where(v > 0, v, LEAKINESS * v)


def _dot_bf16(a_f32, w_bf16):
    # bf16 MXU operands, f32 accumulation
    return jnp.dot(a_f32.astype(jnp.bfloat16), w_bf16,
                   preferred_element_type=jnp.float32)


def node_model_kernel(x_ref, ea_ref, row_ref, col_ref, w_ref, b_ref, o_ref):
    # x_ref  : [N, P] f32   node features (lane-padded to P=128*k)
    # ea_ref : [E, P] f32   edge features (lane-padded)
    # row_ref: [E, 1] i32   source node id per edge
    # col_ref: [1, E] i32   destination node id per edge
    # w_ref  : [8, P, P] bf16  folded weights [W1a, W1b, W2, W3, W4a, W4b, W5, W6]
    # b_ref  : [6, P]    f32   folded biases
    N = x_ref.shape[0]
    E = ea_ref.shape[0]

    x = x_ref[...]
    ea = ea_ref[...]

    # ---- x[row] gather as an exact f32 one-hot matmul (mask built on-chip, no HBM matrix)
    gather_oh = (row_ref[...] ==
                 lax.broadcasted_iota(jnp.int32, (E, N), 1)).astype(jnp.float32)
    xr = jnp.dot(gather_oh, x, preferred_element_type=jnp.float32)        # [E, P]

    # ---- node_mlp_1 over edges (concat removed: first dot split into two dots)
    h = (_dot_bf16(_bn_norm(xr), w_ref[0])
         + _dot_bf16(_bn_norm(ea), w_ref[1]) + b_ref[0])
    h = _leaky_relu(h)
    h = _dot_bf16(_bn_norm(h), w_ref[2]) + b_ref[1]
    h = _leaky_relu(h)
    h = _dot_bf16(_bn_norm(h), w_ref[3]) + b_ref[2]                       # [E, P]

    # ---- scatter-sum onto destination nodes (one-hot built on-chip, f32-exact sum)
    scatter_oh = (col_ref[...] ==
                  lax.broadcasted_iota(jnp.int32, (N, E), 0)).astype(jnp.float32)
    agg = jnp.dot(scatter_oh, h, preferred_element_type=jnp.float32)      # [N, P]

    # ---- node_mlp_2 over nodes (concat removed: first dot split into two dots)
    z = (_dot_bf16(_bn_norm(x), w_ref[4])
         + _dot_bf16(_bn_norm(agg), w_ref[5]) + b_ref[3])
    z = _leaky_relu(z)
    z = _dot_bf16(_bn_norm(z), w_ref[6]) + b_ref[4]
    z = _leaky_relu(z)
    z = _dot_bf16(_bn_norm(z), w_ref[7]) + b_ref[5]

    o_ref[...] = z.astype(o_ref.dtype)   # full 128-lane store, sliced in the wrapper


def _pad2(a, rows, cols):
    return jnp.pad(a, ((0, rows - a.shape[0]), (0, cols - a.shape[1])))


def _prepare_params(params, node_feature_size, lane_width):
    """Fold BN gamma/beta into the following Linear, split the two concat-facing
    weight matrices, zero-pad everything to `lane_width`, and stack."""
    folded_w, folded_b = [], []
    for i in range(6):
        gamma, beta, w, b = params[4 * i: 4 * i + 4]
        folded_w.append(gamma[:, None] * w)      # W' = gamma * W
        folded_b.append(beta @ w + b)            # b' = beta @ W + b
    Fn = node_feature_size
    w1a, w1b = folded_w[0][:Fn], folded_w[0][Fn:]   # x[row] | edge_attr split
    w4a, w4b = folded_w[3][:Fn], folded_w[3][Fn:]   # x      | agg       split
    ws = [w1a, w1b, folded_w[1], folded_w[2], w4a, w4b, folded_w[4], folded_w[5]]
    w_stack = jnp.stack([_pad2(w.astype(jnp.float32), lane_width, lane_width)
                         for w in ws]).astype(jnp.bfloat16)
    b_stack = jnp.stack([jnp.pad(b.astype(jnp.float32), (0, lane_width - b.shape[0]))
                         for b in folded_b])
    return w_stack, b_stack


def node_model_forward(x, edge_index, edge_attr, params, u=None, batch=None):
    """params: flat list [gamma, beta, W, b] x 6 layers (mlp_1 then mlp_2).
    Linear weights W are stored [in, out] (torch weight transposed)."""
    del u, batch  # unused by the reference forward as well
    N, Fn = x.shape
    E, Fe = edge_attr.shape
    L = params[2].shape[1]  # layer_size = out-features of the first Linear

    # lane width: pad every feature dim up to a multiple of 128 (covers Fe and Fn+L)
    P = ((max(Fe, Fn + L) + 127) // 128) * 128

    x_p = _pad2(x.astype(jnp.float32), N, P)
    ea_p = _pad2(edge_attr.astype(jnp.float32), E, P)
    row = edge_index[0].astype(jnp.int32).reshape(E, 1)
    col = edge_index[1].astype(jnp.int32).reshape(1, E)
    w_stack, b_stack = _prepare_params(params, Fn, P)

    vmem = pl.BlockSpec(memory_space=pltpu.MemorySpace.VMEM)
    # TODO(synk): for large graphs, add a row-tiled grid over edges/nodes with
    # two-pass BatchNorm statistics (sum / sum-of-squares accumulation) so E and N
    # need not be fully VMEM-resident; at these sizes one fused block is optimal.
    out = pl.pallas_call(
        node_model_kernel,
        out_shape=jax.ShapeDtypeStruct((N, P), jnp.float32),
        in_specs=[vmem] * 6,
        out_specs=vmem,
        compiler_params=pltpu.CompilerParams(vmem_limit_bytes=32 * 1024 * 1024),
    )(x_p, ea_p, row, col, w_stack, b_stack)
    return out[:, :Fn]


def init_params(key, edge_feature_size, node_feature_size, layer_size):
    entry = node_feature_size + edge_feature_size
    entry2 = node_feature_size + layer_size
    layer_dims = [
        (entry, layer_size), (layer_size, layer_size), (layer_size, layer_size),  # mlp_1
        (entry2, entry2), (entry2, entry2), (entry2, node_feature_size),          # mlp_2
    ]
    params = []
    for din, dout in layer_dims:
        key, k1, k2, k3, k4 = jax.random.split(key, 5)
        gamma = 1.0 + 0.1 * jax.random.normal(k1, (din,), jnp.float32)
        beta = 0.1 * jax.random.normal(k2, (din,), jnp.float32)
        w = jax.random.normal(k3, (din, dout), jnp.float32) / jnp.sqrt(din)
        b = 0.1 * jax.random.normal(k4, (dout,), jnp.float32)
        params += [gamma, beta, w, b]
    return params


def reference_forward(x, edge_index, edge_attr, params):
    """Pure-JAX reference with the original module semantics; Linear dots use the
    same bf16-operand / f32-accumulation precision as the kernel's MXU path."""
    row, col = edge_index
    N = x.shape[0]

    def bn_lin(v, i):
        gamma, beta, w, b = params[4 * i: 4 * i + 4]
        vn = _bn_norm(v)
        wf = (gamma[:, None] * w).astype(jnp.bfloat16)   # same folding as the kernel
        bf = beta @ w + b
        return jnp.dot(vn.astype(jnp.bfloat16), wf,
                       preferred_element_type=jnp.float32) + bf

    e = jnp.concatenate([x[row], edge_attr], axis=1)
    h = _leaky_relu(bn_lin(e, 0))
    h = _leaky_relu(bn_lin(h, 1))
    h = bn_lin(h, 2)
    agg = jnp.zeros((N, h.shape[1]), jnp.float32).at[col].add(h)  # scatter-sum
    n = jnp.concatenate([x, agg], axis=1)
    z = _leaky_relu(bn_lin(n, 3))
    z = _leaky_relu(bn_lin(z, 4))
    z = bn_lin(z, 5)
    return z


if __name__ == "__main__":
    node_feature_size, edge_feature_size, layer_size = 16, 16, 32
    num_nodes, num_edges = 8, 16

    key = jax.random.PRNGKey(0)
    kx, ke, kr, kc, kp = jax.random.split(key, 5)
    x = jax.random.normal(kx, (num_nodes, node_feature_size), jnp.float32)
    edge_attr = jax.random.normal(ke, (num_edges, edge_feature_size), jnp.float32)
    row = jax.random.randint(kr, (num_edges,), 0, num_nodes)
    col = jax.random.randint(kc, (num_edges,), 0, num_nodes)
    edge_index = jnp.stack([row, col])
    u = jnp.zeros((1, 4), jnp.float32)          # unused by forward
    batch = jnp.zeros((num_nodes,), jnp.int32)  # unused by forward

    params = init_params(kp, edge_feature_size, node_feature_size, layer_size)

    out = node_model_forward(x, edge_index, edge_attr, params, u, batch)
    out = jax.block_until_ready(out)
    assert out.shape == (num_nodes, node_feature_size)
    assert jnp.all(jnp.isfinite(out))

    ref = reference_forward(x, edge_index, edge_attr, params)
    max_err = float(jnp.max(jnp.abs(out - ref)))
    assert max_err < 1e-2, f"max abs err vs reference: {max_err}"
    print("KERNEL_OK")
</pallas_src>

<mosaic_0001>
module attributes {stable_mosaic.version = 11 : i64} {
  func.func @node_model_kernel(%arg0: memref<8x128xf32, #tpu.memory_space<vmem>>, %arg1: memref<16x128xf32, #tpu.memory_space<vmem>>, %arg2: memref<16x1xi32, #tpu.memory_space<vmem>>, %arg3: memref<1x16xi32, #tpu.memory_space<vmem>>, %arg4: memref<8x128x128xbf16, #tpu.memory_space<vmem>>, %arg5: memref<6x128xf32, #tpu.memory_space<vmem>>, %arg6: memref<8x128xf32, #tpu.memory_space<vmem>>) attributes {dimension_semantics = [], scalar_prefetch = 0 : i64, scratch_operands = 0 : i64, tpu.core_type = #tpu.core_type<tc>} {
    %c0 = arith.constant 0 : index
    %c0_0 = arith.constant 0 : index
    %0 = vector.load %arg0[%c0, %c0_0] : memref<8x128xf32, #tpu.memory_space<vmem>>, vector<8x128xf32>
    %c0_1 = arith.constant 0 : index
    %c0_2 = arith.constant 0 : index
    %1 = vector.load %arg1[%c0_1, %c0_2] : memref<16x128xf32, #tpu.memory_space<vmem>>, vector<16x128xf32>
    %c0_3 = arith.constant 0 : index
    %c0_4 = arith.constant 0 : index
    %2 = vector.load %arg2[%c0_3, %c0_4] : memref<16x1xi32, #tpu.memory_space<vmem>>, vector<16x1xi32>
    %3 = tpu.iota {dimensions = array<i32: 1>} : vector<16x8xi32>
    %4 = vector.broadcast %2 : vector<16x1xi32> to vector<16x8xi32>
    %5 = arith.cmpi eq, %4, %3 : vector<16x8xi32>
    %6 = arith.extui %5 : vector<16x8xi1> to vector<16x8xi32>
    %7 = arith.sitofp %6 : vector<16x8xi32> to vector<16x8xf32>
    %cst = arith.constant dense<0.000000e+00> : vector<16x128xf32>
    %8 = tpu.matmul %7, %0, %cst {dimension_numbers = #tpu.dot_dimension_numbers<[1], [0], [0], [1], [0, 0, 1, 1], [], []>} : vector<16x8xf32>, vector<8x128xf32>, vector<16x128xf32> -> vector<16x128xf32>
    %cst_5 = arith.constant dense<0.000000e+00> : vector<128xf32>
    %9 = vector.multi_reduction <add>, %8, %cst_5 [0] : vector<16x128xf32> to vector<128xf32>
    %10 = vector.shape_cast %9 : vector<128xf32> to vector<1x128xf32>
    %cst_6 = arith.constant 1.600000e+01 : f32
    %11 = vector.broadcast %cst_6 : f32 to vector<1x128xf32>
    %12 = arith.divf %10, %11 : vector<1x128xf32>
    %13 = vector.broadcast %12 : vector<1x128xf32> to vector<16x128xf32>
    %14 = arith.subf %8, %13 : vector<16x128xf32>
    %15 = arith.mulf %14, %14 : vector<16x128xf32>
    %cst_7 = arith.constant dense<0.000000e+00> : vector<128xf32>
    %16 = vector.multi_reduction <add>, %15, %cst_7 [0] : vector<16x128xf32> to vector<128xf32>
    %17 = vector.shape_cast %16 : vector<128xf32> to vector<1x128xf32>
    %cst_8 = arith.constant 1.600000e+01 : f32
    %18 = vector.broadcast %cst_8 : f32 to vector<1x128xf32>
    %19 = arith.divf %17, %18 : vector<1x128xf32>
    %cst_9 = arith.constant 9.99999974E-6 : f32
    %20 = vector.broadcast %cst_9 : f32 to vector<1x128xf32>
    %21 = arith.addf %19, %20 : vector<1x128xf32>
    %22 = math.rsqrt %21 : vector<1x128xf32>
    %23 = vector.broadcast %22 : vector<1x128xf32> to vector<16x128xf32>
    %24 = arith.mulf %14, %23 : vector<16x128xf32>
    %c0_10 = arith.constant 0 : index
    %c0_11 = arith.constant 0 : index
    %c0_12 = arith.constant 0 : index
    %25 = vector.load %arg4[%c0_10, %c0_11, %c0_12] : memref<8x128x128xbf16, #tpu.memory_space<vmem>>, vector<1x128x128xbf16>
    %26 = vector.shape_cast %25 : vector<1x128x128xbf16> to vector<128x128xbf16>
    %27 = arith.truncf %24 : vector<16x128xf32> to vector<16x128xbf16>
    %cst_13 = arith.constant dense<0.000000e+00> : vector<16x128xf32>
    %28 = tpu.matmul %27, %26, %cst_13 {dimension_numbers = #tpu.dot_dimension_numbers<[1], [0], [0], [1], [0, 0, 1, 1], [], []>} : vector<16x128xbf16>, vector<128x128xbf16>, vector<16x128xf32> -> vector<16x128xf32>
    %cst_14 = arith.constant dense<0.000000e+00> : vector<128xf32>
    %29 = vector.multi_reduction <add>, %1, %cst_14 [0] : vector<16x128xf32> to vector<128xf32>
    %30 = vector.shape_cast %29 : vector<128xf32> to vector<1x128xf32>
    %cst_15 = arith.constant 1.600000e+01 : f32
    %31 = vector.broadcast %cst_15 : f32 to vector<1x128xf32>
    %32 = arith.divf %30, %31 : vector<1x128xf32>
    %33 = vector.broadcast %32 : vector<1x128xf32> to vector<16x128xf32>
    %34 = arith.subf %1, %33 : vector<16x128xf32>
    %35 = arith.mulf %34, %34 : vector<16x128xf32>
    %cst_16 = arith.constant dense<0.000000e+00> : vector<128xf32>
    %36 = vector.multi_reduction <add>, %35, %cst_16 [0] : vector<16x128xf32> to vector<128xf32>
    %37 = vector.shape_cast %36 : vector<128xf32> to vector<1x128xf32>
    %cst_17 = arith.constant 1.600000e+01 : f32
    %38 = vector.broadcast %cst_17 : f32 to vector<1x128xf32>
    %39 = arith.divf %37, %38 : vector<1x128xf32>
    %cst_18 = arith.constant 9.99999974E-6 : f32
    %40 = vector.broadcast %cst_18 : f32 to vector<1x128xf32>
    %41 = arith.addf %39, %40 : vector<1x128xf32>
    %42 = math.rsqrt %41 : vector<1x128xf32>
    %43 = vector.broadcast %42 : vector<1x128xf32> to vector<16x128xf32>
    %44 = arith.mulf %34, %43 : vector<16x128xf32>
    %c1 = arith.constant 1 : index
    %c0_19 = arith.constant 0 : index
    %c0_20 = arith.constant 0 : index
    %45 = vector.load %arg4[%c1, %c0_19, %c0_20] : memref<8x128x128xbf16, #tpu.memory_space<vmem>>, vector<1x128x128xbf16>
    %46 = vector.shape_cast %45 : vector<1x128x128xbf16> to vector<128x128xbf16>
    %47 = arith.truncf %44 : vector<16x128xf32> to vector<16x128xbf16>
    %cst_21 = arith.constant dense<0.000000e+00> : vector<16x128xf32>
    %48 = tpu.matmul %47, %46, %cst_21 {dimension_numbers = #tpu.dot_dimension_numbers<[1], [0], [0], [1], [0, 0, 1, 1], [], []>} : vector<16x128xbf16>, vector<128x128xbf16>, vector<16x128xf32> -> vector<16x128xf32>
    %49 = arith.addf %28, %48 : vector<16x128xf32>
    %c0_22 = arith.constant 0 : index
    %c0_23 = arith.constant 0 : index
    %50 = vector.load %arg5[%c0_22, %c0_23] : memref<6x128xf32, #tpu.memory_space<vmem>>, vector<1x128xf32>
    %51 = vector.shape_cast %50 : vector<1x128xf32> to vector<128xf32>
    %52 = vector.shape_cast %51 : vector<128xf32> to vector<1x128xf32>
    %53 = vector.broadcast %52 : vector<1x128xf32> to vector<16x128xf32>
    %54 = arith.addf %49, %53 : vector<16x128xf32>
    %cst_24 = arith.constant 0.000000e+00 : f32
    %55 = vector.broadcast %cst_24 : f32 to vector<16x128xf32>
    %56 = arith.cmpf ogt, %54, %55 : vector<16x128xf32>
    %cst_25 = arith.constant 1.000000e-01 : f32
    %57 = vector.broadcast %cst_25 : f32 to vector<16x128xf32>
    %58 = arith.mulf %57, %54 : vector<16x128xf32>
    %59 = arith.select %56, %54, %58 : vector<16x128xi1>, vector<16x128xf32>
    %cst_26 = arith.constant dense<0.000000e+00> : vector<128xf32>
    %60 = vector.multi_reduction <add>, %59, %cst_26 [0] : vector<16x128xf32> to vector<128xf32>
    %61 = vector.shape_cast %60 : vector<128xf32> to vector<1x128xf32>
    %cst_27 = arith.constant 1.600000e+01 : f32
    %62 = vector.broadcast %cst_27 : f32 to vector<1x128xf32>
    %63 = arith.divf %61, %62 : vector<1x128xf32>
    %64 = vector.broadcast %63 : vector<1x128xf32> to vector<16x128xf32>
    %65 = arith.subf %59, %64 : vector<16x128xf32>
    %66 = arith.mulf %65, %65 : vector<16x128xf32>
    %cst_28 = arith.constant dense<0.000000e+00> : vector<128xf32>
    %67 = vector.multi_reduction <add>, %66, %cst_28 [0] : vector<16x128xf32> to vector<128xf32>
    %68 = vector.shape_cast %67 : vector<128xf32> to vector<1x128xf32>
    %cst_29 = arith.constant 1.600000e+01 : f32
    %69 = vector.broadcast %cst_29 : f32 to vector<1x128xf32>
    %70 = arith.divf %68, %69 : vector<1x128xf32>
    %cst_30 = arith.constant 9.99999974E-6 : f32
    %71 = vector.broadcast %cst_30 : f32 to vector<1x128xf32>
    %72 = arith.addf %70, %71 : vector<1x128xf32>
    %73 = math.rsqrt %72 : vector<1x128xf32>
    %74 = vector.broadcast %73 : vector<1x128xf32> to vector<16x128xf32>
    %75 = arith.mulf %65, %74 : vector<16x128xf32>
    %c2 = arith.constant 2 : index
    %c0_31 = arith.constant 0 : index
    %c0_32 = arith.constant 0 : index
    %76 = vector.load %arg4[%c2, %c0_31, %c0_32] : memref<8x128x128xbf16, #tpu.memory_space<vmem>>, vector<1x128x128xbf16>
    %77 = vector.shape_cast %76 : vector<1x128x128xbf16> to vector<128x128xbf16>
    %78 = arith.truncf %75 : vector<16x128xf32> to vector<16x128xbf16>
    %cst_33 = arith.constant dense<0.000000e+00> : vector<16x128xf32>
    %79 = tpu.matmul %78, %77, %cst_33 {dimension_numbers = #tpu.dot_dimension_numbers<[1], [0], [0], [1], [0, 0, 1, 1], [], []>} : vector<16x128xbf16>, vector<128x128xbf16>, vector<16x128xf32> -> vector<16x128xf32>
    %c1_34 = arith.constant 1 : index
    %c0_35 = arith.constant 0 : index
    %80 = vector.load %arg5[%c1_34, %c0_35] : memref<6x128xf32, #tpu.memory_space<vmem>>, vector<1x128xf32>
    %81 = vector.shape_cast %80 : vector<1x128xf32> to vector<128xf32>
    %82 = vector.shape_cast %81 : vector<128xf32> to vector<1x128xf32>
    %83 = vector.broadcast %82 : vector<1x128xf32> to vector<16x128xf32>
    %84 = arith.addf %79, %83 : vector<16x128xf32>
    %cst_36 = arith.constant 0.000000e+00 : f32
    %85 = vector.broadcast %cst_36 : f32 to vector<16x128xf32>
    %86 = arith.cmpf ogt, %84, %85 : vector<16x128xf32>
    %cst_37 = arith.constant 1.000000e-01 : f32
    %87 = vector.broadcast %cst_37 : f32 to vector<16x128xf32>
    %88 = arith.mulf %87, %84 : vector<16x128xf32>
    %89 = arith.select %86, %84, %88 : vector<16x128xi1>, vector<16x128xf32>
    %cst_38 = arith.constant dense<0.000000e+00> : vector<128xf32>
    %90 = vector.multi_reduction <add>, %89, %cst_38 [0] : vector<16x128xf32> to vector<128xf32>
    %91 = vector.shape_cast %90 : vector<128xf32> to vector<1x128xf32>
    %cst_39 = arith.constant 1.600000e+01 : f32
    %92 = vector.broadcast %cst_39 : f32 to vector<1x128xf32>
    %93 = arith.divf %91, %92 : vector<1x128xf32>
    %94 = vector.broadcast %93 : vector<1x128xf32> to vector<16x128xf32>
    %95 = arith.subf %89, %94 : vector<16x128xf32>
    %96 = arith.mulf %95, %95 : vector<16x128xf32>
    %cst_40 = arith.constant dense<0.000000e+00> : vector<128xf32>
    %97 = vector.multi_reduction <add>, %96, %cst_40 [0] : vector<16x128xf32> to vector<128xf32>
    %98 = vector.shape_cast %97 : vector<128xf32> to vector<1x128xf32>
    %cst_41 = arith.constant 1.600000e+01 : f32
    %99 = vector.broadcast %cst_41 : f32 to vector<1x128xf32>
    %100 = arith.divf %98, %99 : vector<1x128xf32>
    %cst_42 = arith.constant 9.99999974E-6 : f32
    %101 = vector.broadcast %cst_42 : f32 to vector<1x128xf32>
    %102 = arith.addf %100, %101 : vector<1x128xf32>
    %103 = math.rsqrt %102 : vector<1x128xf32>
    %104 = vector.broadcast %103 : vector<1x128xf32> to vector<16x128xf32>
    %105 = arith.mulf %95, %104 : vector<16x128xf32>
    %c3 = arith.constant 3 : index
    %c0_43 = arith.constant 0 : index
    %c0_44 = arith.constant 0 : index
    %106 = vector.load %arg4[%c3, %c0_43, %c0_44] : memref<8x128x128xbf16, #tpu.memory_space<vmem>>, vector<1x128x128xbf16>
    %107 = vector.shape_cast %106 : vector<1x128x128xbf16> to vector<128x128xbf16>
    %108 = arith.truncf %105 : vector<16x128xf32> to vector<16x128xbf16>
    %cst_45 = arith.constant dense<0.000000e+00> : vector<16x128xf32>
    %109 = tpu.matmul %108, %107, %cst_45 {dimension_numbers = #tpu.dot_dimension_numbers<[1], [0], [0], [1], [0, 0, 1, 1], [], []>} : vector<16x128xbf16>, vector<128x128xbf16>, vector<16x128xf32> -> vector<16x128xf32>
    %c2_46 = arith.constant 2 : index
    %c0_47 = arith.constant 0 : index
    %110 = vector.load %arg5[%c2_46, %c0_47] : memref<6x128xf32, #tpu.memory_space<vmem>>, vector<1x128xf32>
    %111 = vector.shape_cast %110 : vector<1x128xf32> to vector<128xf32>
    %112 = vector.shape_cast %111 : vector<128xf32> to vector<1x128xf32>
    %113 = vector.broadcast %112 : vector<1x128xf32> to vector<16x128xf32>
    %114 = arith.addf %109, %113 : vector<16x128xf32>
    %c0_48 = arith.constant 0 : index
    %c0_49 = arith.constant 0 : index
    %115 = vector.load %arg3[%c0_48, %c0_49] : memref<1x16xi32, #tpu.memory_space<vmem>>, vector<1x16xi32>
    %116 = tpu.iota {dimensions = array<i32: 0>} : vector<8x16xi32>
    %117 = vector.broadcast %115 : vector<1x16xi32> to vector<8x16xi32>
    %118 = arith.cmpi eq, %117, %116 : vector<8x16xi32>
    %119 = arith.extui %118 : vector<8x16xi1> to vector<8x16xi32>
    %120 = arith.sitofp %119 : vector<8x16xi32> to vector<8x16xf32>
    %cst_50 = arith.constant dense<0.000000e+00> : vector<8x128xf32>
    %121 = tpu.matmul %120, %114, %cst_50 {dimension_numbers = #tpu.dot_dimension_numbers<[1], [0], [0], [1], [0, 0, 1, 1], [], []>} : vector<8x16xf32>, vector<16x128xf32>, vector<8x128xf32> -> vector<8x128xf32>
    %cst_51 = arith.constant dense<0.000000e+00> : vector<128xf32>
    %122 = vector.multi_reduction <add>, %0, %cst_51 [0] : vector<8x128xf32> to vector<128xf32>
    %123 = vector.shape_cast %122 : vector<128xf32> to vector<1x128xf32>
    %cst_52 = arith.constant 8.000000e+00 : f32
    %124 = vector.broadcast %cst_52 : f32 to vector<1x128xf32>
    %125 = arith.divf %123, %124 : vector<1x128xf32>
    %126 = vector.broadcast %125 : vector<1x128xf32> to vector<8x128xf32>
    %127 = arith.subf %0, %126 : vector<8x128xf32>
    %128 = arith.mulf %127, %127 : vector<8x128xf32>
    %cst_53 = arith.constant dense<0.000000e+00> : vector<128xf32>
    %129 = vector.multi_reduction <add>, %128, %cst_53 [0] : vector<8x128xf32> to vector<128xf32>
    %130 = vector.shape_cast %129 : vector<128xf32> to vector<1x128xf32>
    %cst_54 = arith.constant 8.000000e+00 : f32
    %131 = vector.broadcast %cst_54 : f32 to vector<1x128xf32>
    %132 = arith.divf %130, %131 : vector<1x128xf32>
    %cst_55 = arith.constant 9.99999974E-6 : f32
    %133 = vector.broadcast %cst_55 : f32 to vector<1x128xf32>
    %134 = arith.addf %132, %133 : vector<1x128xf32>
    %135 = math.rsqrt %134 : vector<1x128xf32>
    %136 = vector.broadcast %135 : vector<1x128xf32> to vector<8x128xf32>
    %137 = arith.mulf %127, %136 : vector<8x128xf32>
    %c4 = arith.constant 4 : index
    %c0_56 = arith.constant 0 : index
    %c0_57 = arith.constant 0 : index
    %138 = vector.load %arg4[%c4, %c0_56, %c0_57] : memref<8x128x128xbf16, #tpu.memory_space<vmem>>, vector<1x128x128xbf16>
    %139 = vector.shape_cast %138 : vector<1x128x128xbf16> to vector<128x128xbf16>
    %140 = arith.truncf %137 : vector<8x128xf32> to vector<8x128xbf16>
    %cst_58 = arith.constant dense<0.000000e+00> : vector<8x128xf32>
    %141 = tpu.matmul %140, %139, %cst_58 {dimension_numbers = #tpu.dot_dimension_numbers<[1], [0], [0], [1], [0, 0, 1, 1], [], []>} : vector<8x128xbf16>, vector<128x128xbf16>, vector<8x128xf32> -> vector<8x128xf32>
    %cst_59 = arith.constant dense<0.000000e+00> : vector<128xf32>
    %142 = vector.multi_reduction <add>, %121, %cst_59 [0] : vector<8x128xf32> to vector<128xf32>
    %143 = vector.shape_cast %142 : vector<128xf32> to vector<1x128xf32>
    %cst_60 = arith.constant 8.000000e+00 : f32
    %144 = vector.broadcast %cst_60 : f32 to vector<1x128xf32>
    %145 = arith.divf %143, %144 : vector<1x128xf32>
    %146 = vector.broadcast %145 : vector<1x128xf32> to vector<8x128xf32>
    %147 = arith.subf %121, %146 : vector<8x128xf32>
    %148 = arith.mulf %147, %147 : vector<8x128xf32>
    %cst_61 = arith.constant dense<0.000000e+00> : vector<128xf32>
    %149 = vector.multi_reduction <add>, %148, %cst_61 [0] : vector<8x128xf32> to vector<128xf32>
    %150 = vector.shape_cast %149 : vector<128xf32> to vector<1x128xf32>
    %cst_62 = arith.constant 8.000000e+00 : f32
    %151 = vector.broadcast %cst_62 : f32 to vector<1x128xf32>
    %152 = arith.divf %150, %151 : vector<1x128xf32>
    %cst_63 = arith.constant 9.99999974E-6 : f32
    %153 = vector.broadcast %cst_63 : f32 to vector<1x128xf32>
    %154 = arith.addf %152, %153 : vector<1x128xf32>
    %155 = math.rsqrt %154 : vector<1x128xf32>
    %156 = vector.broadcast %155 : vector<1x128xf32> to vector<8x128xf32>
    %157 = arith.mulf %147, %156 : vector<8x128xf32>
    %c5 = arith.constant 5 : index
    %c0_64 = arith.constant 0 : index
    %c0_65 = arith.constant 0 : index
    %158 = vector.load %arg4[%c5, %c0_64, %c0_65] : memref<8x128x128xbf16, #tpu.memory_space<vmem>>, vector<1x128x128xbf16>
    %159 = vector.shape_cast %158 : vector<1x128x128xbf16> to vector<128x128xbf16>
    %160 = arith.truncf %157 : vector<8x128xf32> to vector<8x128xbf16>
    %cst_66 = arith.constant dense<0.000000e+00> : vector<8x128xf32>
    %161 = tpu.matmul %160, %159, %cst_66 {dimension_numbers = #tpu.dot_dimension_numbers<[1], [0], [0], [1], [0, 0, 1, 1], [], []>} : vector<8x128xbf16>, vector<128x128xbf16>, vector<8x128xf32> -> vector<8x128xf32>
    %162 = arith.addf %141, %161 : vector<8x128xf32>
    %c3_67 = arith.constant 3 : index
    %c0_68 = arith.constant 0 : index
    %163 = vector.load %arg5[%c3_67, %c0_68] : memref<6x128xf32, #tpu.memory_space<vmem>>, vector<1x128xf32>
    %164 = vector.shape_cast %163 : vector<1x128xf32> to vector<128xf32>
    %165 = vector.shape_cast %164 : vector<128xf32> to vector<1x128xf32>
    %166 = vector.broadcast %165 : vector<1x128xf32> to vector<8x128xf32>
    %167 = arith.addf %162, %166 : vector<8x128xf32>
    %cst_69 = arith.constant 0.000000e+00 : f32
    %168 = vector.broadcast %cst_69 : f32 to vector<8x128xf32>
    %169 = arith.cmpf ogt, %167, %168 : vector<8x128xf32>
    %cst_70 = arith.constant 1.000000e-01 : f32
    %170 = vector.broadcast %cst_70 : f32 to vector<8x128xf32>
    %171 = arith.mulf %170, %167 : vector<8x128xf32>
    %172 = arith.select %169, %167, %171 : vector<8x128xi1>, vector<8x128xf32>
    %cst_71 = arith.constant dense<0.000000e+00> : vector<128xf32>
    %173 = vector.multi_reduction <add>, %172, %cst_71 [0] : vector<8x128xf32> to vector<128xf32>
    %174 = vector.shape_cast %173 : vector<128xf32> to vector<1x128xf32>
    %cst_72 = arith.constant 8.000000e+00 : f32
    %175 = vector.broadcast %cst_72 : f32 to vector<1x128xf32>
    %176 = arith.divf %174, %175 : vector<1x128xf32>
    %177 = vector.broadcast %176 : vector<1x128xf32> to vector<8x128xf32>
    %178 = arith.subf %172, %177 : vector<8x128xf32>
    %179 = arith.mulf %178, %178 : vector<8x128xf32>
    %cst_73 = arith.constant dense<0.000000e+00> : vector<128xf32>
    %180 = vector.multi_reduction <add>, %179, %cst_73 [0] : vector<8x128xf32> to vector<128xf32>
    %181 = vector.shape_cast %180 : vector<128xf32> to vector<1x128xf32>
    %cst_74 = arith.constant 8.000000e+00 : f32
    %182 = vector.broadcast %cst_74 : f32 to vector<1x128xf32>
    %183 = arith.divf %181, %182 : vector<1x128xf32>
    %cst_75 = arith.constant 9.99999974E-6 : f32
    %184 = vector.broadcast %cst_75 : f32 to vector<1x128xf32>
    %185 = arith.addf %183, %184 : vector<1x128xf32>
    %186 = math.rsqrt %185 : vector<1x128xf32>
    %187 = vector.broadcast %186 : vector<1x128xf32> to vector<8x128xf32>
    %188 = arith.mulf %178, %187 : vector<8x128xf32>
    %c6 = arith.constant 6 : index
    %c0_76 = arith.constant 0 : index
    %c0_77 = arith.constant 0 : index
    %189 = vector.load %arg4[%c6, %c0_76, %c0_77] : memref<8x128x128xbf16, #tpu.memory_space<vmem>>, vector<1x128x128xbf16>
    %190 = vector.shape_cast %189 : vector<1x128x128xbf16> to vector<128x128xbf16>
    %191 = arith.truncf %188 : vector<8x128xf32> to vector<8x128xbf16>
    %cst_78 = arith.constant dense<0.000000e+00> : vector<8x128xf32>
    %192 = tpu.matmul %191, %190, %cst_78 {dimension_numbers = #tpu.dot_dimension_numbers<[1], [0], [0], [1], [0, 0, 1, 1], [], []>} : vector<8x128xbf16>, vector<128x128xbf16>, vector<8x128xf32> -> vector<8x128xf32>
    %c4_79 = arith.constant 4 : index
    %c0_80 = arith.constant 0 : index
    %193 = vector.load %arg5[%c4_79, %c0_80] : memref<6x128xf32, #tpu.memory_space<vmem>>, vector<1x128xf32>
    %194 = vector.shape_cast %193 : vector<1x128xf32> to vector<128xf32>
    %195 = vector.shape_cast %194 : vector<128xf32> to vector<1x128xf32>
    %196 = vector.broadcast %195 : vector<1x128xf32> to vector<8x128xf32>
    %197 = arith.addf %192, %196 : vector<8x128xf32>
    %cst_81 = arith.constant 0.000000e+00 : f32
    %198 = vector.broadcast %cst_81 : f32 to vector<8x128xf32>
    %199 = arith.cmpf ogt, %197, %198 : vector<8x128xf32>
    %cst_82 = arith.constant 1.000000e-01 : f32
    %200 = vector.broadcast %cst_82 : f32 to vector<8x128xf32>
    %201 = arith.mulf %200, %197 : vector<8x128xf32>
    %202 = arith.select %199, %197, %201 : vector<8x128xi1>, vector<8x128xf32>
    %cst_83 = arith.constant dense<0.000000e+00> : vector<128xf32>
    %203 = vector.multi_reduction <add>, %202, %cst_83 [0] : vector<8x128xf32> to vector<128xf32>
    %204 = vector.shape_cast %203 : vector<128xf32> to vector<1x128xf32>
    %cst_84 = arith.constant 8.000000e+00 : f32
    %205 = vector.broadcast %cst_84 : f32 to vector<1x128xf32>
    %206 = arith.divf %204, %205 : vector<1x128xf32>
    %207 = vector.broadcast %206 : vector<1x128xf32> to vector<8x128xf32>
    %208 = arith.subf %202, %207 : vector<8x128xf32>
    %209 = arith.mulf %208, %208 : vector<8x128xf32>
    %cst_85 = arith.constant dense<0.000000e+00> : vector<128xf32>
    %210 = vector.multi_reduction <add>, %209, %cst_85 [0] : vector<8x128xf32> to vector<128xf32>
    %211 = vector.shape_cast %210 : vector<128xf32> to vector<1x128xf32>
    %cst_86 = arith.constant 8.000000e+00 : f32
    %212 = vector.broadcast %cst_86 : f32 to vector<1x128xf32>
    %213 = arith.divf %211, %212 : vector<1x128xf32>
    %cst_87 = arith.constant 9.99999974E-6 : f32
    %214 = vector.broadcast %cst_87 : f32 to vector<1x128xf32>
    %215 = arith.addf %213, %214 : vector<1x128xf32>
    %216 = math.rsqrt %215 : vector<1x128xf32>
    %217 = vector.broadcast %216 : vector<1x128xf32> to vector<8x128xf32>
    %218 = arith.mulf %208, %217 : vector<8x128xf32>
    %c7 = arith.constant 7 : index
    %c0_88 = arith.constant 0 : index
    %c0_89 = arith.constant 0 : index
    %219 = vector.load %arg4[%c7, %c0_88, %c0_89] : memref<8x128x128xbf16, #tpu.memory_space<vmem>>, vector<1x128x128xbf16>
    %220 = vector.shape_cast %219 : vector<1x128x128xbf16> to vector<128x128xbf16>
    %221 = arith.truncf %218 : vector<8x128xf32> to vector<8x128xbf16>
    %cst_90 = arith.constant dense<0.000000e+00> : vector<8x128xf32>
    %222 = tpu.matmul %221, %220, %cst_90 {dimension_numbers = #tpu.dot_dimension_numbers<[1], [0], [0], [1], [0, 0, 1, 1], [], []>} : vector<8x128xbf16>, vector<128x128xbf16>, vector<8x128xf32> -> vector<8x128xf32>
    %c5_91 = arith.constant 5 : index
    %c0_92 = arith.constant 0 : index
    %223 = vector.load %arg5[%c5_91, %c0_92] : memref<6x128xf32, #tpu.memory_space<vmem>>, vector<1x128xf32>
    %224 = vector.shape_cast %223 : vector<1x128xf32> to vector<128xf32>
    %225 = vector.shape_cast %224 : vector<128xf32> to vector<1x128xf32>
    %226 = vector.broadcast %225 : vector<1x128xf32> to vector<8x128xf32>
    %227 = arith.addf %222, %226 : vector<8x128xf32>
    %c0_93 = arith.constant 0 : index
    %c0_94 = arith.constant 0 : index
    %228 = vector.load %arg6[%c0_93, %c0_94] : memref<8x128xf32, #tpu.memory_space<vmem>>, vector<8x128xf32>
    tpu.vector_store %arg6[%c0_93, %c0_94], %227 {strides = array<i32>} : memref<8x128xf32, #tpu.memory_space<vmem>>, vector<8x128xf32>,
    return
  }
}

</mosaic_0001>

<bundles_post_ra>
// kernel: tpu_custom_call.1
= control target key start
LH: loop header
LB: loop body
LE: loop exit
PB: predicated region body
PF: predicated region fallthrough
CT: control target
= control target key end

     0   :  { %11 = vsyncpa [#allocation3], 0  ;;  %s1671_s0 = inlined_call_operand.hbm [shape: f32[8,128], index: 0, kind: input, shape index: {}]   ;;  %s1672_s1 = inlined_call_operand.vmem [shape: f32[16,128], index: 1, kind: input, shape index: {}]   ;;  %s1673_s2 = inlined_call_operand.vmem [shape: s32[16,1], index: 2, kind: input, shape index: {}]   ;;  %s1674_s3 = inlined_call_operand.vmem [shape: s32[1,16], index: 3, kind: input, shape index: {}]   ;;  %s1675_s4 = inlined_call_operand.hbm [shape: bf16[8,128,128], index: 4, kind: input, shape index: {}]   ;;  %s1676_s5 = inlined_call_operand.hbm [shape: f32[6,128], index: 5, kind: input, shape index: {}]   ;;  %s1677_s6 = inlined_call_operand.hbm [shape: f32[8,128], index: 6, kind: output, shape index: {}]  }
   0x1   :  { %12 = vsyncpa [#allocation6], 0  ;;  %s35_s23 = sshll.u32 %s1675_s4, 4  ;;  %s36_s23 = int_to_ptr.hbm [resolvable:$true] %s35_s23 }
   0x2   :  { %13 = vsyncpa [#allocation4], 0  ;;  %s1558_s24 = smov [#allocation5]   ;;  %s19_s28 = sshll.u32 %s1671_s0, 4  ;;  %s20_s28 = int_to_ptr.hbm [resolvable:$true] %s19_s28 }
   0x3   :  { %s37_s25 = sshll.u32 %s1558_s24, 4  ;;  %s1559_s29 = smov 64   ;;  %s38_s25 = int_to_ptr.vmem [resolvable:$true] %s37_s25 }
   0x4   :  { %s1560_s30 = smov 4   ;;  %s1561_s7 = smov [#allocation2]  }
   0x5   :  { %43 = dma.hbm_to_vmem [thread:$0]  %s36_s23, 8192, %s38_s25, [#allocation6], %s1559_s29, %s1559_s29, %s1560_s30  }
   0x6   :  { %s21_s8 = sshll.u32 %s1561_s7, 4  ;;  %s49_s11 = sshll.u32 %s1676_s5, 4  ;;  %s22_s8 = int_to_ptr.vmem [resolvable:$true] %s21_s8  ;;  %s50_s11 = int_to_ptr.hbm [resolvable:$true] %s49_s11 }
   0x7   :  { %24 = dma.hbm_to_vmem [thread:$0]  %s20_s28, 128, %s22_s8, [#allocation3]  }
   0x8   :  { %s1562_s4 = smov [#allocation7]  }
   0x9   :  { %s51_s12 = sshll.u32 %s1562_s4, 4  ;;  %s52_s12 = int_to_ptr.vmem [resolvable:$true] %s51_s12 }
   0xa   :  { %54 = dma.hbm_to_vmem [thread:$0]  %s50_s11, 128, %s52_s12, [#allocation6]  }
   0xb   :  { %1552 = dma.done.wait [#allocation3], 128  }
   0xc   :  { %1553 = vsyncadd [#allocation3], 4294967168 }
   0xd   :  { %1554 = dma.done.wait [#allocation6], 8320  }
   0xe   :  { %1555 = vsyncadd [#allocation6], 4294958976  ;;  %v1563_v0 = vmov 0   ;;  %v70_v1 = vld [vmem:[%s1673_s2] sm:$0xff]  ;;  %v71_v2 = vld [vmem:[%s1673_s2 + $0x8] sm:$0xff]  ;;  %v72_v4 = vlaneseq  ;;  %vm86_vm0 = vcmask 64512  }
   0xf   :  { %1428 = vset.pattern.permute.xlu0 %v1563_v0  ;;  %v1618_v3 = vld [vmem:[#allocation2] sm:$0xff]  ;;  %v1564_v7 = vmov 0.0   ;;  %v1565_v11 = vmov 16.0   ;;  %v69_v13 = vld [vmem:[%s1672_s1 + $0x8] sm:$0xff]  ;;  %v1368_v35 = vld [vmem:[#allocation5 + $0x70] sm:$0xff]  ;;  %s1081_s22 = sshll.u32 %s1677_s6, 4  ;;  %s1082_s22 = int_to_ptr.hbm [resolvable:$true] %s1081_s22 }
  0x10   :  { %75 = vperm.xlu0 %1428, %v70_v1   ;;  %108 = vmatpush.msra.mxu0 %v1618_v3  ;;  %v73_v5 = vand.u32 127, %v72_v4  ;;  %1436 = vrcp.f32 %v1565_v11  ;;  %v68_v12 = vld [vmem:[%s1672_s1] sm:$0xff]  ;;  %v1360_v36 = vld [vmem:[#allocation5 + $0x30] sm:$0xff]  ;;  %v1367_v40 = vld [vmem:[#allocation5 + $0x68] sm:$0xff] }
  0x11   :  { %v173_v14 = vadd.f32 %v69_v13, %v68_v12  ;;  %v1369_v32 = vld [vmem:[#allocation5 + $0x78] sm:$0xff]  ;;  %v1359_v41 = vld [vmem:[#allocation5 + $0x28] sm:$0xff]  ;;  %v1366_v44 = vld [vmem:[#allocation5 + $0x60] sm:$0xff] }
  0x12   :  { %v1361_v33 = vld [vmem:[#allocation5 + $0x38] sm:$0xff]  ;;  %272 = vmatpush.bf16.msra.mxu1 %v1369_v32  ;;  %v1358_v45 = vld [vmem:[#allocation5 + $0x20] sm:$0xff]  ;;  %v1364_v56 = vld [vmem:[#allocation5 + $0x50] sm:$0xff] }
  0x13   :  { %v174_v15 = vrot.slane %v173_v14, 4  ;;  %334 = vmatpush.bf16.msra.mxu2 %v1361_v33  ;;  %v1365_v50 = vld [vmem:[#allocation5 + $0x58] sm:$0xff]  ;;  %v1356_v57 = vld [vmem:[#allocation5 + $0x10] sm:$0xff]  ;;  %v1363_v60 = vld [vmem:[#allocation5 + $0x48] sm:$0xff] }
  0x14   :  { %v1357_v51 = vld [vmem:[#allocation5 + $0x18] sm:$0xff]  ;;  %v1355_v61 = vld [vmem:[#allocation5 + $0x8] sm:$0xff] }
  0x15   :  { %v175_v17 = vadd.f32 %v174_v15, %v173_v14 }
  0x16   :  { %v1437_v16 = vpop.eup %1436  ;;  %273 = vmatpush.bf16.msra.mxu1 %v1368_v35 }
  0x17   :  { %v124_v18 = vmul.f32 16.0, %v1437_v16  ;;  %v176_v19 = vrot.slane %v175_v17, 2  ;;  %vm128_vm3 = vweird.f32 %v1437_v16  ;;  %335 = vmatpush.bf16.msra.mxu2 %v1360_v36 }
  0x18   :  { %78 = vperm.xlu0 %1428, %v71_v2   ;;  %v1362_v2 = vld [vmem:[#allocation5 + $0x40] sm:$0xff] }
  0x19   :  { %v125_v20 = vsub.f32 1.0, %v124_v18  ;;  %v177_v21 = vadd.f32 %v176_v19, %v175_v17 }
  0x1a   :  { %274 = vmatpush.bf16.msra.mxu1 %v1367_v40  ;;  %v1377_v40 = vld [vmem:[#allocation5 + $0xb8] sm:$0xff] }
  0x1b   :  { %v126_v22 = vmul.f32 %v1437_v16, %v125_v20  ;;  %v178_v23 = vrot.slane %v177_v21, 1  ;;  %336 = vmatpush.bf16.msra.mxu2 %v1359_v41  ;;  %459 = vmatpush.bf16.msra.mxu3 %v1377_v40  ;;  %v1376_v41 = vld [vmem:[#allocation5 + $0xb0] sm:$0xff] }
  0x1d   :  { %v127_v24 = vadd.f32 %v1437_v16, %v126_v22  ;;  %v179_v25 = vadd.f32 %v178_v23, %v177_v21 }
  0x1e   :  { %275 = vmatpush.bf16.msra.mxu1 %v1366_v44  ;;  %v1373_v44 = vld [vmem:[#allocation5 + $0x98] sm:$0xff] }
  0x1f   :  { %v1630_v26 = vsel %vm128_vm3, %v1437_v16, %v127_v24  ;;  %337 = vmatpush.bf16.msra.mxu2 %v1358_v45  ;;  %460 = vmatpush.bf16.msra.mxu3 %v1376_v41  ;;  %v1382_v41 = vld [vmem:[#allocation5 + $0xe0] sm:$0xff] }
  0x20   :  { %v180_v27 = vmul.f32 %v179_v25, %v1630_v26 }
  0x22   :  { %v1633_v28 = vsub.f32 %v68_v12, %v180_v27  ;;  %v1635_v29 = vsub.f32 %v69_v13, %v180_v27  ;;  %276 = vmatpush.bf16.msra.mxu1 %v1365_v50  ;;  %v1371_v50 = vld [vmem:[#allocation5 + $0x88] sm:$0xff] }
  0x23   :  { %338 = vmatpush.bf16.msra.mxu2 %v1357_v51 }
  0x24   :  { %v183_v30 = vmul.f32 %v1633_v28, %v1633_v28  ;;  %v184_v31 = vmul.f32 %v1635_v29, %v1635_v29 }
  0x26   :  { %v185_v34 = vadd.f32 %v184_v31, %v183_v30  ;;  %277 = vmatpush.bf16.msra.mxu1 %v1364_v56 }
  0x27   :  { %339 = vmatpush.bf16.msra.mxu2 %v1356_v57 }
  0x28   :  { %v186_v37 = vrot.slane %v185_v34, 4 }
  0x2a   :  { %v187_v38 = vadd.f32 %v186_v37, %v185_v34  ;;  %278 = vmatpush.bf16.msra.mxu1 %v1363_v60 }
  0x2b   :  { %340 = vmatpush.bf16.msra.mxu2 %v1355_v61 }
  0x2c   :  { %v188_v42 = vrot.slane %v187_v38, 2 }
  0x2e   :  { %v189_v43 = vadd.f32 %v188_v42, %v187_v38  ;;  %279 = vmatpush.bf16.msra.mxu1 %v1362_v2  ;;  %v1375_v42 = vld [vmem:[#allocation5 + $0xa8] sm:$0xff] }
  0x2f   :  { %461 = vmatpush.bf16.msra.mxu3 %v1375_v42 }
  0x30   :  { %v190_v46 = vrot.slane %v189_v43, 1 }
  0x32   :  { %v191_v47 = vadd.f32 %v190_v46, %v189_v43  ;;  %v1374_v43 = vld [vmem:[#allocation5 + $0xa0] sm:$0xff]  ;;  %v1372_v46 = vld [vmem:[#allocation5 + $0x90] sm:$0xff] }
  0x33   :  { %462 = vmatpush.bf16.msra.mxu3 %v1374_v43 }
  0x34   :  { %v192_v52 = vmul.f32 %v191_v47, %v1630_v26 }
  0x36   :  { %v193_v54 = vadd.f32 1e-05, %v192_v52  ;;  %v1370_v52 = vld [vmem:[#allocation5 + $0x80] sm:$0xff] }
  0x37   :  { %463 = vmatpush.bf16.msra.mxu3 %v1373_v44 }
  0x38   :  { %1438 = vrsqrt.f32 %v193_v54  ;;  %vm200_vm4 = vweird.f32 %v193_v54 }
  0x3b   :  { %464 = vmatpush.bf16.msra.mxu3 %v1372_v46  ;;  %v1381_v46 = vld [vmem:[#allocation5 + $0xd8] sm:$0xff] }
  0x3e   :  { %v1439_v62 = vpop.eup %1438 }
  0x3f   :  { %v195_v0 = vmul.f32 %v1439_v62, %v193_v54  ;;  %vm201_vm5 = vweird.f32 %v1439_v62  ;;  %465 = vmatpush.bf16.msra.mxu3 %v1371_v50 }
  0x40   :  { %vm202_vm6 = vmor %vm200_vm4, %vm201_vm5  ;;  %vm601_vm5 = vcmask 130048  }
  0x43   :  { %466 = vmatpush.bf16.msra.mxu3 %v1370_v52  ;;  %v1379_v52 = vld [vmem:[#allocation5 + $0xc8] sm:$0xff] }
  0x82   :  { %v76_v6 = vpop.permute.xlu0 %75 }
  0x83   :  { %vm80_vm1 = vcmp.eq.s32.totalorder %v76_v6, %v73_v5  ;;  %v196_v6 = vmul.f32 %v1439_v62, %v195_v0 }
  0x84   :  { %v1092_v8 = vsel %vm80_vm1, 1.0, %v1564_v7 }
  0x85   :  { %1094 = vmatmul.msk.f32.vlgmr.msra.gmra.mxu0 %vm86_vm0, %v1092_v8 }
  0x8a   :  { %v79_v9 = vpop.permute.xlu0 %78 }
  0x8b   :  { %vm81_vm2 = vcmp.eq.s32.totalorder %v79_v9, %v73_v5  ;;  %v1354_v5 = vld [vmem:[#allocation5] sm:$0xff]  ;;  %v197_v9 = vmul.f32 0.5, %v196_v6 }
  0x8c   :  { %v1093_v10 = vsel %vm81_vm2, 1.0, %v1564_v7  ;;  %341 = vmatpush.bf16.msra.mxu2 %v1354_v5 }
  0x8d   :  { %1095 = vmatmul.msk.f32.gmra.mxu0 %vm86_vm0, %v1093_v10  ;;  %v198_v12 = vsub.f32 1.5, %v197_v9 }
  0x8f   :  { %v199_v15 = vmul.f32 %v1439_v62, %v198_v12 }
  0x91   :  { %v203_v17 = vsel %vm202_vm6, %v1439_v62, %v199_v15 }
  0x92   :  { %v204_v18 = vmul.f32 %v203_v17, %v1633_v28  ;;  %v205_v19 = vmul.f32 %v203_v17, %v1635_v29 }
  0x94   :  { %v223_v21 = vpack.c.bf16 %v205_v19, %v204_v18 }
  0x96   :  { %280 = vmatmul.bf16.vlgmr.msra.gmra.mxu1 %v223_v21 }
 0x102   :  { %v110_v39 = vpop.f32.mrf.mxu0 }
 0x10a   :  { %v113_v48 = vpop.f32.mrf.mxu0 }
 0x10b   :  { %v116_v49 = vadd.f32 %v113_v48, %v110_v39 }
 0x10d   :  { %v117_v53 = vrot.slane %v116_v49, 4 }
 0x10f   :  { %v118_v55 = vadd.f32 %v117_v53, %v116_v49  ;;  %v1429_v49 = vld [vmem:[#allocation7] ss:$0 sm:$0xff] }
 0x111   :  { %v119_v58 = vrot.slane %v118_v55, 2 }
 0x113   :  { %v120_v59 = vadd.f32 %v119_v58, %v118_v55  ;;  %v281_v45 = vpop.f32.mrf.mxu1 }
 0x115   :  { %v121_v63 = vrot.slane %v120_v59, 1 }
 0x117   :  { %v122_v1 = vadd.f32 %v121_v63, %v120_v59 }
 0x119   :  { %v130_v8 = vmul.f32 %v1630_v26, %v122_v1 }
 0x11b   :  { %v132_v10 = vsub.f32 %v113_v48, %v130_v8  ;;  %v131_v11 = vsub.f32 %v110_v39, %v130_v8  ;;  %v283_v53 = vpop.f32.mrf.mxu1 }
 0x11d   :  { %v134_v13 = vmul.f32 %v132_v10, %v132_v10  ;;  %v133_v14 = vmul.f32 %v131_v11, %v131_v11 }
 0x11f   :  { %v135_v16 = vadd.f32 %v134_v13, %v133_v14 }
 0x121   :  { %v136_v20 = vrot.slane %v135_v16, 4 }
 0x123   :  { %v137_v22 = vadd.f32 %v136_v20, %v135_v16 }
 0x125   :  { %v138_v23 = vrot.slane %v137_v22, 2 }
 0x127   :  { %v139_v24 = vadd.f32 %v138_v23, %v137_v22 }
 0x129   :  { %v140_v25 = vrot.slane %v139_v24, 1 }
 0x12b   :  { %v141_v27 = vadd.f32 %v140_v25, %v139_v24 }
 0x12d   :  { %v142_v30 = vmul.f32 %v141_v27, %v1630_v26 }
 0x12f   :  { %v143_v31 = vadd.f32 1e-05, %v142_v30 }
 0x131   :  { %1440 = vrsqrt.f32 %v143_v31  ;;  %vm150_vm8 = vweird.f32 %v143_v31 }
 0x137   :  { %v1441_v32 = vpop.eup %1440 }
 0x138   :  { %v145_v33 = vmul.f32 %v1441_v32, %v143_v31  ;;  %vm151_vm7 = vweird.f32 %v1441_v32 }
 0x139   :  { %vm152_vm9 = vmor %vm150_vm8, %vm151_vm7 }
 0x13a   :  { %v146_v34 = vmul.f32 %v1441_v32, %v145_v33 }
 0x13c   :  { %v147_v35 = vmul.f32 0.5, %v146_v34 }
 0x13e   :  { %v148_v36 = vsub.f32 1.5, %v147_v35  ;;  %v1385_v35 = vld [vmem:[#allocation5 + $0xf8] sm:$0xff] }
 0x13f   :  { %580 = vmatpush.bf16.msrb.mxu0 %v1385_v35 }
 0x140   :  { %v149_v28 = vmul.f32 %v1441_v32, %v148_v36  ;;  %v1430_v36 = vld [vmem:[#allocation7 + $0x1] ss:$0 sm:$0xff] }
 0x142   :  { %v153_v29 = vsel %vm152_vm9, %v1441_v32, %v149_v28  ;;  %v1384_v28 = vld [vmem:[#allocation5 + $0xf0] sm:$0xff] }
 0x143   :  { %v154_v37 = vmul.f32 %v153_v29, %v131_v11  ;;  %v155_v38 = vmul.f32 %v153_v29, %v132_v10  ;;  %581 = vmatpush.bf16.msrb.mxu0 %v1384_v28 }
 0x145   :  { %v172_v39 = vpack.c.bf16 %v155_v38, %v154_v37  ;;  %v1383_v37 = vld [vmem:[#allocation5 + $0xe8] sm:$0xff] }
 0x147   :  { %342 = vmatmul.bf16.vlgmr.msra.gmra.mxu2 %v172_v39  ;;  %582 = vmatpush.bf16.msrb.mxu0 %v1383_v37 }
 0x14b   :  { %583 = vmatpush.bf16.msrb.mxu0 %v1382_v41 }
 0x14f   :  { %584 = vmatpush.bf16.msrb.mxu0 %v1381_v46 }
 0x1ca   :  { %v343_v47 = vpop.f32.mrf.mxu2 }
 0x1cb   :  { %v344_v48 = vadd.f32 %v343_v47, %v281_v45 }
 0x1cd   :  { %v350_v51 = vadd.f32 %v1429_v49, %v344_v48 }
 0x1cf   :  { %v354_v56 = vmul.f32 0.1, %v350_v51  ;;  %vm352_vm10 = vcmp.gt.f32.partialorder %v350_v51, 0.0 }
 0x1d1   :  { %v356_v59 = vsel %vm352_vm10, %v350_v51, %v354_v56 }
 0x1d2   :  { %v345_v54 = vpop.f32.mrf.mxu2 }
 0x1d3   :  { %v346_v55 = vadd.f32 %v345_v54, %v283_v53 }
 0x1d5   :  { %v351_v57 = vadd.f32 %v1429_v49, %v346_v55  ;;  %v1380_v49 = vld [vmem:[#allocation5 + $0xd0] sm:$0xff]  ;;  %v1378_v55 = vld [vmem:[#allocation5 + $0xc0] sm:$0xff] }
 0x1d6   :  { %585 = vmatpush.bf16.msrb.mxu0 %v1380_v49 }
 0x1d7   :  { %vm353_vm11 = vcmp.gt.f32.partialorder %v351_v57, 0.0  ;;  %v355_v58 = vmul.f32 0.1, %v351_v57 }
 0x1d9   :  { %v357_v60 = vsel %vm353_vm11, %v351_v57, %v355_v58 }
 0x1da   :  { %v358_v61 = vadd.f32 %v357_v60, %v356_v59  ;;  %586 = vmatpush.bf16.msrb.mxu0 %v1379_v52 }
 0x1dc   :  { %v359_v62 = vrot.slane %v358_v61, 4 }
 0x1de   :  { %v360_v63 = vadd.f32 %v359_v62, %v358_v61  ;;  %587 = vmatpush.bf16.msrb.mxu0 %v1378_v55 }
 0x1e0   :  { %v361_v0 = vrot.slane %v360_v63, 2 }
 0x1e2   :  { %v362_v1 = vadd.f32 %v361_v0, %v360_v63 }
 0x1e4   :  { %v363_v2 = vrot.slane %v362_v1, 1 }
 0x1e6   :  { %v364_v5 = vadd.f32 %v363_v2, %v362_v1 }
 0x1e8   :  { %v365_v6 = vmul.f32 %v364_v5, %v1630_v26 }
 0x1ea   :  { %v366_v8 = vsub.f32 %v356_v59, %v365_v6  ;;  %v367_v9 = vsub.f32 %v357_v60, %v365_v6 }
 0x1ec   :  { %v368_v10 = vmul.f32 %v366_v8, %v366_v8  ;;  %v369_v11 = vmul.f32 %v367_v9, %v367_v9 }
 0x1ee   :  { %v370_v12 = vadd.f32 %v369_v11, %v368_v10 }
 0x1f0   :  { %v371_v13 = vrot.slane %v370_v12, 4 }
 0x1f2   :  { %v372_v14 = vadd.f32 %v371_v13, %v370_v12 }
 0x1f4   :  { %v373_v15 = vrot.slane %v372_v14, 2 }
 0x1f6   :  { %v374_v16 = vadd.f32 %v373_v15, %v372_v14 }
 0x1f8   :  { %v375_v17 = vrot.slane %v374_v16, 1 }
 0x1fa   :  { %v376_v18 = vadd.f32 %v375_v17, %v374_v16 }
 0x1fc   :  { %v377_v19 = vmul.f32 %v376_v18, %v1630_v26 }
 0x1fe   :  { %v378_v20 = vadd.f32 1e-05, %v377_v19 }
 0x200   :  { %1442 = vrsqrt.f32 %v378_v20  ;;  %vm385_vm13 = vweird.f32 %v378_v20 }
 0x206   :  { %v1443_v21 = vpop.eup %1442 }
 0x207   :  { %v380_v22 = vmul.f32 %v1443_v21, %v378_v20  ;;  %vm386_vm12 = vweird.f32 %v1443_v21  ;;  %v596_v20 = vshrl.u32 %v72_v4, 7  ;;  %v1566_v4 = vmov 8.0  }
 0x208   :  { %vm387_vm14 = vmor %vm385_vm13, %vm386_vm12 }
 0x209   :  { %v381_v23 = vmul.f32 %v1443_v21, %v380_v22 }
 0x20b   :  { %v382_v24 = vmul.f32 0.5, %v381_v23 }
 0x20d   :  { %v383_v25 = vsub.f32 1.5, %v382_v24 }
 0x20f   :  { %v384_v27 = vmul.f32 %v1443_v21, %v383_v25 }
 0x211   :  { %v388_v30 = vsel %vm387_vm14, %v1443_v21, %v384_v27  ;;  %v1431_v21 = vld [vmem:[#allocation7 + $0x2] ss:$0 sm:$0xff]  ;;  %v625_v27 = vrot.slane %v1618_v3, 4 }
 0x212   :  { %v389_v31 = vmul.f32 %v388_v30, %v366_v8  ;;  %v390_v32 = vmul.f32 %v388_v30, %v367_v9 }
 0x213   :  { %v626_v30 = vadd.f32 %v625_v27, %v1618_v3 }
 0x214   :  { %v408_v33 = vpack.c.bf16 %v390_v32, %v389_v31 }
 0x215   :  { %v627_v31 = vrot.slane %v626_v30, 2 }
 0x216   :  { %467 = vmatmul.bf16.vlgmr.msra.gmra.mxu3 %v408_v33 }
 0x217   :  { %v628_v33 = vadd.f32 %v627_v31, %v626_v30 }
 0x299   :  { %v468_v34 = vpop.f32.mrf.mxu3 }
 0x29a   :  { %v469_v29 = vadd.f32 %v1430_v36, %v468_v34 }
 0x29c   :  { %v475_v39 = vmul.f32 0.1, %v469_v29  ;;  %vm473_vm15 = vcmp.gt.f32.partialorder %v469_v29, 0.0 }
 0x29e   :  { %v477_v43 = vsel %vm473_vm15, %v469_v29, %v475_v39 }
 0x2a1   :  { %v470_v38 = vpop.f32.mrf.mxu3 }
 0x2a2   :  { %v471_v40 = vadd.f32 %v1430_v36, %v470_v38  ;;  %v629_v36 = vrot.slane %v628_v33, 1 }
 0x2a4   :  { %vm474_vm0 = vcmp.gt.f32.partialorder %v471_v40, 0.0  ;;  %v476_v42 = vmul.f32 0.1, %v471_v40  ;;  %v630_v37 = vadd.f32 %v629_v36, %v628_v33 }
 0x2a6   :  { %v478_v44 = vsel %vm474_vm0, %v471_v40, %v476_v42 }
 0x2a7   :  { %v479_v45 = vadd.f32 %v478_v44, %v477_v43 }
 0x2a9   :  { %v480_v47 = vrot.slane %v479_v45, 4 }
 0x2ab   :  { %v481_v48 = vadd.f32 %v480_v47, %v479_v45  ;;  %v1392_v47 = vld [vmem:[#allocation5 + $0x130] sm:$0xff] }
 0x2ad   :  { %v482_v50 = vrot.slane %v481_v48, 2 }
 0x2af   :  { %v483_v51 = vadd.f32 %v482_v50, %v481_v48  ;;  %v1401_v50 = vld [vmem:[#allocation5 + $0x178] sm:$0xff] }
 0x2b0   :  { %772 = vmatpush.bf16.msrb.mxu2 %v1401_v50 }
 0x2b1   :  { %v484_v53 = vrot.slane %v483_v51, 1 }
 0x2b3   :  { %v485_v54 = vadd.f32 %v484_v53, %v483_v51  ;;  %v1391_v51 = vld [vmem:[#allocation5 + $0x128] sm:$0xff]  ;;  %v1390_v53 = vld [vmem:[#allocation5 + $0x120] sm:$0xff] }
 0x2b5   :  { %v486_v56 = vmul.f32 %v485_v54, %v1630_v26  ;;  %v1399_v54 = vld [vmem:[#allocation5 + $0x168] sm:$0xff] }
 0x2b7   :  { %v488_v57 = vsub.f32 %v478_v44, %v486_v56  ;;  %v487_v58 = vsub.f32 %v477_v43, %v486_v56  ;;  %v1393_v44 = vld [vmem:[#allocation5 + $0x138] sm:$0xff] }
 0x2b8   :  { %833 = vmatpush.bf16.msrb.mxu3 %v1393_v44  ;;  %v1389_v56 = vld [vmem:[#allocation5 + $0x118] sm:$0xff] }
 0x2b9   :  { %v490_v59 = vmul.f32 %v488_v57, %v488_v57  ;;  %v489_v60 = vmul.f32 %v487_v58, %v487_v58 }
 0x2bb   :  { %v491_v61 = vadd.f32 %v490_v59, %v489_v60  ;;  %v1398_v59 = vld [vmem:[#allocation5 + $0x160] sm:$0xff]  ;;  %v1388_v60 = vld [vmem:[#allocation5 + $0x110] sm:$0xff] }
 0x2bc   :  { %834 = vmatpush.bf16.msrb.mxu3 %v1392_v47  ;;  %v1407_v47 = vld [vmem:[#allocation5 + $0x1a8] sm:$0xff] }
 0x2bd   :  { %v492_v62 = vrot.slane %v491_v61, 4 }
 0x2bf   :  { %v493_v63 = vadd.f32 %v492_v62, %v491_v61 }
 0x2c0   :  { %835 = vmatpush.bf16.msrb.mxu3 %v1391_v51  ;;  %v1406_v51 = vld [vmem:[#allocation5 + $0x1a0] sm:$0xff] }
 0x2c1   :  { %v494_v0 = vrot.slane %v493_v63, 2 }
 0x2c3   :  { %v495_v1 = vadd.f32 %v494_v0, %v493_v63 }
 0x2c4   :  { %836 = vmatpush.bf16.msrb.mxu3 %v1390_v53  ;;  %v1405_v53 = vld [vmem:[#allocation5 + $0x198] sm:$0xff] }
 0x2c5   :  { %v496_v2 = vrot.slane %v495_v1, 1 }
 0x2c7   :  { %v497_v5 = vadd.f32 %v496_v2, %v495_v1  ;;  %v1397_v1 = vld [vmem:[#allocation5 + $0x158] sm:$0xff]  ;;  %v1387_v2 = vld [vmem:[#allocation5 + $0x108] sm:$0xff] }
 0x2c8   :  { %837 = vmatpush.bf16.msrb.mxu3 %v1389_v56  ;;  %v1404_v56 = vld [vmem:[#allocation5 + $0x190] sm:$0xff] }
 0x2c9   :  { %v498_v6 = vmul.f32 %v497_v5, %v1630_v26  ;;  %v1432_v26 = vld [vmem:[%s1674_s3] ss:$0 sm:$0xff]  ;;  %s1567_s3 = smov [#allocation8]  }
 0x2ca   :  { %vm598_vm4 = vcmp.eq.s32.totalorder %v1432_v26, %v596_v20  ;;  %v1394_v26 = vld [vmem:[#allocation5 + $0x140] sm:$0xff]  ;;  %s1079_s19 = sshll.u32 %s1567_s3, 4  ;;  %s1080_s19 = int_to_ptr.vmem [resolvable:$true] %s1079_s19 }
 0x2cb   :  { %v499_v8 = vadd.f32 1e-05, %v498_v6  ;;  %v1224_v25 = vsel %vm598_vm4, 1.0, %v1564_v7 }
 0x2cc   :  { %838 = vmatpush.bf16.msrb.mxu3 %v1388_v60 }
 0x2cd   :  { %1444 = vrsqrt.f32 %v499_v8  ;;  %vm506_vm2 = vweird.f32 %v499_v8 }
 0x2ce   :  { %1446 = vrcp.f32 %v1566_v4 }
 0x2d0   :  { %839 = vmatpush.bf16.msrb.mxu3 %v1387_v2 }
 0x2d3   :  { %v1445_v9 = vpop.eup %1444 }
 0x2d4   :  { %v501_v10 = vmul.f32 %v1445_v9, %v499_v8  ;;  %vm507_vm1 = vweird.f32 %v1445_v9  ;;  %v1447_v32 = vpop.eup %1446 }
 0x2d5   :  { %vm508_vm3 = vmor %vm506_vm2, %vm507_vm1  ;;  %v632_v34 = vmul.f32 8.0, %v1447_v32  ;;  %vm636_vm6 = vweird.f32 %v1447_v32 }
 0x2d6   :  { %v502_v11 = vmul.f32 %v1445_v9, %v501_v10  ;;  %v1396_v10 = vld [vmem:[#allocation5 + $0x150] sm:$0xff] }
 0x2d7   :  { %v633_v35 = vsub.f32 1.0, %v632_v34 }
 0x2d8   :  { %v503_v12 = vmul.f32 0.5, %v502_v11  ;;  %v1386_v11 = vld [vmem:[#allocation5 + $0x100] sm:$0xff] }
 0x2d9   :  { %v634_v28 = vmul.f32 %v1447_v32, %v633_v35  ;;  %840 = vmatpush.bf16.msrb.mxu3 %v1386_v11 }
 0x2da   :  { %v504_v13 = vsub.f32 1.5, %v503_v12 }
 0x2db   :  { %v635_v29 = vadd.f32 %v1447_v32, %v634_v28 }
 0x2dc   :  { %v505_v14 = vmul.f32 %v1445_v9, %v504_v13 }
 0x2dd   :  { %v1657_v7 = vsel %vm636_vm6, %v1447_v32, %v635_v29 }
 0x2de   :  { %v509_v15 = vsel %vm508_vm3, %v1445_v9, %v505_v14  ;;  %v638_v38 = vmul.f32 %v1657_v7, %v630_v37 }
 0x2df   :  { %v510_v16 = vmul.f32 %v509_v15, %v487_v58  ;;  %v511_v17 = vmul.f32 %v509_v15, %v488_v57 }
 0x2e0   :  { %v639_v39 = vsub.f32 %v1618_v3, %v638_v38  ;;  %v1400_v3 = vld [vmem:[#allocation5 + $0x170] sm:$0xff] }
 0x2e1   :  { %v529_v18 = vpack.c.bf16 %v511_v17, %v510_v16  ;;  %773 = vmatpush.bf16.msrb.mxu2 %v1400_v3  ;;  %v1395_v17 = vld [vmem:[#allocation5 + $0x148] sm:$0xff] }
 0x2e2   :  { %v640_v40 = vmul.f32 %v639_v39, %v639_v39 }
 0x2e3   :  { %588 = vmatmul.bf16.vlgmr.msrb.gmra.mxu0 %v529_v18 }
 0x2e4   :  { %v641_v41 = vrot.slane %v640_v40, 4 }
 0x2e5   :  { %774 = vmatpush.bf16.msrb.mxu2 %v1399_v54 }
 0x2e6   :  { %v642_v42 = vadd.f32 %v641_v41, %v640_v40  ;;  %v1433_v40 = vld [vmem:[#allocation7 + $0x3] ss:$0 sm:$0xff]  ;;  %v1409_v41 = vld [vmem:[#allocation5 + $0x1b8] sm:$0xff] }
 0x2e7   :  { %948 = vmatpush.bf16.msra.mxu0 %v1409_v41 }
 0x2e8   :  { %v643_v43 = vrot.slane %v642_v42, 2 }
 0x2e9   :  { %775 = vmatpush.bf16.msrb.mxu2 %v1398_v59  ;;  %v1403_v59 = vld [vmem:[#allocation5 + $0x188] sm:$0xff] }
 0x2ea   :  { %v644_v45 = vadd.f32 %v643_v43, %v642_v42 }
 0x2ec   :  { %v645_v46 = vrot.slane %v644_v45, 1 }
 0x2ed   :  { %776 = vmatpush.bf16.msrb.mxu2 %v1397_v1 }
 0x2ee   :  { %v646_v48 = vadd.f32 %v645_v46, %v644_v45  ;;  %v1408_v45 = vld [vmem:[#allocation5 + $0x1b0] sm:$0xff] }
 0x2ef   :  { %949 = vmatpush.bf16.msra.mxu0 %v1408_v45 }
 0x2f0   :  { %v647_v49 = vmul.f32 %v646_v48, %v1657_v7 }
 0x2f1   :  { %777 = vmatpush.bf16.msrb.mxu2 %v1396_v10 }
 0x2f2   :  { %v648_v52 = vadd.f32 1e-05, %v647_v49 }
 0x2f3   :  { %950 = vmatpush.bf16.msra.mxu0 %v1407_v47 }
 0x2f4   :  { %1448 = vrsqrt.f32 %v648_v52  ;;  %vm655_vm7 = vweird.f32 %v648_v52 }
 0x2f5   :  { %778 = vmatpush.bf16.msrb.mxu2 %v1395_v17 }
 0x2f7   :  { %951 = vmatpush.bf16.msra.mxu0 %v1406_v51 }
 0x2f9   :  { %779 = vmatpush.bf16.msrb.mxu2 %v1394_v26 }
 0x2fa   :  { %v1449_v57 = vpop.eup %1448 }
 0x2fb   :  { %v650_v61 = vmul.f32 %v1449_v57, %v648_v52  ;;  %vm656_vm8 = vweird.f32 %v1449_v57  ;;  %952 = vmatpush.bf16.msra.mxu0 %v1405_v53 }
 0x2fc   :  { %vm657_vm9 = vmor %vm655_vm7, %vm656_vm8 }
 0x2fd   :  { %v651_v63 = vmul.f32 %v1449_v57, %v650_v61 }
 0x2ff   :  { %v652_v5 = vmul.f32 0.5, %v651_v63  ;;  %953 = vmatpush.bf16.msra.mxu0 %v1404_v56 }
 0x301   :  { %v653_v8 = vsub.f32 1.5, %v652_v5 }
 0x303   :  { %v654_v12 = vmul.f32 %v1449_v57, %v653_v8  ;;  %954 = vmatpush.bf16.msra.mxu0 %v1403_v59 }
 0x305   :  { %v658_v14 = vsel %vm657_vm9, %v1449_v57, %v654_v12 }
 0x306   :  { %v659_v16 = vmul.f32 %v658_v14, %v639_v39 }
 0x360   :  { %v589_v19 = vpop.f32.mrf.mxu0 }
 0x361   :  { %v590_v24 = vadd.f32 %v1431_v21, %v589_v19  ;;  %v677_v19 = vpack.c.bf16 %v659_v16, %v659_v16 }
 0x363   :  { %841 = vmatmul.bf16.vlgmr.msrb.gmra.mxu3 %v677_v19  ;;  %v1434_v19 = vld [vmem:[#allocation7 + $0x4] ss:$0 sm:$0xff] }
 0x368   :  { %v591_v22 = vpop.f32.mrf.mxu0 }
 0x369   :  { %v592_v23 = vadd.f32 %v1431_v21, %v591_v22 }
 0x36b   :  { %619 = vmatpush.msrb.mxu1 %v592_v23 }
 0x36d   :  { %620 = vmatpush.msrb.mxu1 %v590_v24 }
 0x36e   :  { %1225 = vmatmul.msk.f32.vlgmr.msrb.gmra.mxu1 %vm601_vm5, %v1224_v25 }
 0x3e6   :  { %v842_v38 = vpop.f32.mrf.mxu3 }
 0x3eb   :  { %v622_v55 = vpop.f32.mrf.mxu1 }
 0x3ec   :  { %v678_v58 = vrot.slane %v622_v55, 4 }
 0x3ee   :  { %v679_v62 = vadd.f32 %v678_v58, %v622_v55  ;;  %v844_v39 = vpop.f32.mrf.mxu3 }
 0x3f0   :  { %v680_v0 = vrot.slane %v679_v62, 2 }
 0x3f2   :  { %v681_v6 = vadd.f32 %v680_v0, %v679_v62  ;;  %v1402_v62 = vld [vmem:[#allocation5 + $0x180] sm:$0xff] }
 0x3f3   :  { %955 = vmatpush.bf16.msra.mxu0 %v1402_v62 }
 0x3f4   :  { %v682_v9 = vrot.slane %v681_v6, 1 }
 0x3f6   :  { %v683_v13 = vadd.f32 %v682_v9, %v681_v6 }
 0x3f8   :  { %v684_v15 = vmul.f32 %v683_v13, %v1657_v7 }
 0x3fa   :  { %v685_v18 = vsub.f32 %v622_v55, %v684_v15 }
 0x3fc   :  { %v686_v20 = vmul.f32 %v685_v18, %v685_v18 }
 0x3fe   :  { %v687_v21 = vrot.slane %v686_v20, 4 }
 0x400   :  { %v688_v22 = vadd.f32 %v687_v21, %v686_v20  ;;  %v1417_v20 = vld [vmem:[#allocation5 + $0x1f8] sm:$0xff] }
 0x401   :  { %1060 = vmatpush.bf16.msra.mxu1 %v1417_v20 }
 0x402   :  { %v689_v23 = vrot.slane %v688_v22, 2 }
 0x404   :  { %v690_v24 = vadd.f32 %v689_v23, %v688_v22  ;;  %v1416_v22 = vld [vmem:[#allocation5 + $0x1f0] sm:$0xff] }
 0x405   :  { %1061 = vmatpush.bf16.msra.mxu1 %v1416_v22 }
 0x406   :  { %v691_v25 = vrot.slane %v690_v24, 1 }
 0x408   :  { %v692_v27 = vadd.f32 %v691_v25, %v690_v24  ;;  %v1415_v24 = vld [vmem:[#allocation5 + $0x1e8] sm:$0xff] }
 0x409   :  { %1062 = vmatpush.bf16.msra.mxu1 %v1415_v24 }
 0x40a   :  { %v693_v30 = vmul.f32 %v692_v27, %v1657_v7 }
 0x40c   :  { %v694_v4 = vadd.f32 1e-05, %v693_v30  ;;  %v1414_v30 = vld [vmem:[#allocation5 + $0x1e0] sm:$0xff] }
 0x40d   :  { %1063 = vmatpush.bf16.msra.mxu1 %v1414_v30 }
 0x40e   :  { %1450 = vrsqrt.f32 %v694_v4  ;;  %vm701_vm11 = vweird.f32 %v694_v4 }
 0x414   :  { %v1451_v31 = vpop.eup %1450 }
 0x415   :  { %v696_v32 = vmul.f32 %v1451_v31, %v694_v4  ;;  %vm702_vm10 = vweird.f32 %v1451_v31 }
 0x416   :  { %vm703_vm12 = vmor %vm701_vm11, %vm702_vm10 }
 0x417   :  { %v697_v33 = vmul.f32 %v1451_v31, %v696_v32 }
 0x419   :  { %v698_v34 = vmul.f32 0.5, %v697_v33  ;;  %v1413_v33 = vld [vmem:[#allocation5 + $0x1d8] sm:$0xff] }
 0x41a   :  { %1064 = vmatpush.bf16.msra.mxu1 %v1413_v33 }
 0x41b   :  { %v699_v35 = vsub.f32 1.5, %v698_v34 }
 0x41d   :  { %v700_v36 = vmul.f32 %v1451_v31, %v699_v35 }
 0x41f   :  { %v704_v28 = vsel %vm703_vm12, %v1451_v31, %v700_v36  ;;  %v1412_v36 = vld [vmem:[#allocation5 + $0x1d0] sm:$0xff] }
 0x420   :  { %v705_v29 = vmul.f32 %v704_v28, %v685_v18  ;;  %1065 = vmatpush.bf16.msra.mxu1 %v1412_v36 }
 0x422   :  { %v723_v37 = vpack.c.bf16 %v705_v29, %v705_v29 }
 0x424   :  { %780 = vmatmul.bf16.vlgmr.msrb.gmra.mxu2 %v723_v37  ;;  %v1411_v37 = vld [vmem:[#allocation5 + $0x1c8] sm:$0xff] }
 0x425   :  { %1066 = vmatpush.bf16.msra.mxu1 %v1411_v37 }
 0x4a7   :  { %v781_v42 = vpop.f32.mrf.mxu2 }
 0x4a8   :  { %v843_v43 = vadd.f32 %v842_v38, %v781_v42 }
 0x4aa   :  { %v848_v44 = vadd.f32 %v1433_v40, %v843_v43  ;;  %v1410_v40 = vld [vmem:[#allocation5 + $0x1c0] sm:$0xff] }
 0x4ab   :  { %1067 = vmatpush.bf16.msra.mxu1 %v1410_v40 }
 0x4ac   :  { %vm849_vm13 = vcmp.gt.f32.partialorder %v848_v44, 0.0  ;;  %v850_v46 = vmul.f32 0.1, %v848_v44 }
 0x4ae   :  { %v851_v48 = vsel %vm849_vm13, %v848_v44, %v850_v46 }
 0x4af   :  { %v852_v49 = vrot.slane %v851_v48, 4  ;;  %v783_v50 = vpop.f32.mrf.mxu2 }
 0x4b1   :  { %v853_v52 = vadd.f32 %v852_v49, %v851_v48 }
 0x4b3   :  { %v854_v3 = vrot.slane %v853_v52, 2 }
 0x4b5   :  { %v855_v54 = vadd.f32 %v854_v3, %v853_v52 }
 0x4b7   :  { %v856_v55 = vrot.slane %v855_v54, 1 }
 0x4b9   :  { %v857_v57 = vadd.f32 %v856_v55, %v855_v54 }
 0x4bb   :  { %v858_v58 = vmul.f32 %v857_v57, %v1657_v7  ;;  %v1435_v57 = vld [vmem:[#allocation7 + $0x5] ss:$0 sm:$0xff] }
 0x4bd   :  { %v859_v60 = vsub.f32 %v851_v48, %v858_v58 }
 0x4bf   :  { %v860_v61 = vmul.f32 %v859_v60, %v859_v60 }
 0x4c1   :  { %v861_v63 = vrot.slane %v860_v61, 4 }
 0x4c3   :  { %v862_v0 = vadd.f32 %v861_v63, %v860_v61 }
 0x4c5   :  { %v863_v1 = vrot.slane %v862_v0, 2 }
 0x4c7   :  { %v864_v2 = vadd.f32 %v863_v1, %v862_v0 }
 0x4c9   :  { %v865_v5 = vrot.slane %v864_v2, 1 }
 0x4cb   :  { %v866_v6 = vadd.f32 %v865_v5, %v864_v2 }
 0x4cd   :  { %v867_v8 = vmul.f32 %v866_v6, %v1657_v7 }
 0x4cf   :  { %v868_v9 = vadd.f32 1e-05, %v867_v8 }
 0x4d1   :  { %1452 = vrsqrt.f32 %v868_v9  ;;  %vm875_vm15 = vweird.f32 %v868_v9 }
 0x4d7   :  { %v1453_v10 = vpop.eup %1452 }
 0x4d8   :  { %v870_v11 = vmul.f32 %v1453_v10, %v868_v9  ;;  %vm876_vm14 = vweird.f32 %v1453_v10 }
 0x4d9   :  { %vm877_vm0 = vmor %vm875_vm15, %vm876_vm14 }
 0x4da   :  { %v871_v12 = vmul.f32 %v1453_v10, %v870_v11 }
 0x4dc   :  { %v872_v13 = vmul.f32 0.5, %v871_v12 }
 0x4de   :  { %v873_v14 = vsub.f32 1.5, %v872_v13 }
 0x4e0   :  { %v874_v15 = vmul.f32 %v1453_v10, %v873_v14 }
 0x4e2   :  { %v878_v16 = vsel %vm877_vm0, %v1453_v10, %v874_v15 }
 0x4e3   :  { %v879_v17 = vmul.f32 %v878_v16, %v859_v60 }
 0x4e5   :  { %v897_v18 = vpack.c.bf16 %v879_v17, %v879_v17 }
 0x4e7   :  { %956 = vmatmul.bf16.vlgmr.msra.gmra.mxu0 %v897_v18 }
 0x564   :  { %v957_v26 = vpop.f32.mrf.mxu0 }
 0x565   :  { %v958_v21 = vadd.f32 %v1434_v19, %v957_v26 }
 0x567   :  { %vm961_vm1 = vcmp.gt.f32.partialorder %v958_v21, 0.0  ;;  %v962_v23 = vmul.f32 0.1, %v958_v21 }
 0x569   :  { %v963_v25 = vsel %vm961_vm1, %v958_v21, %v962_v23 }
 0x56a   :  { %v964_v27 = vrot.slane %v963_v25, 4 }
 0x56c   :  { %v965_v4 = vadd.f32 %v964_v27, %v963_v25  ;;  %v959_v31 = vpop.f32.mrf.mxu0 }
 0x56e   :  { %v966_v32 = vrot.slane %v965_v4, 2 }
 0x570   :  { %v967_v34 = vadd.f32 %v966_v32, %v965_v4 }
 0x572   :  { %v968_v35 = vrot.slane %v967_v34, 1 }
 0x574   :  { %v969_v28 = vadd.f32 %v968_v35, %v967_v34 }
 0x576   :  { %v970_v29 = vmul.f32 %v969_v28, %v1657_v7 }
 0x578   :  { %v971_v38 = vsub.f32 %v963_v25, %v970_v29 }
 0x57a   :  { %v972_v39 = vmul.f32 %v971_v38, %v971_v38 }
 0x57c   :  { %v973_v41 = vrot.slane %v972_v39, 4 }
 0x57e   :  { %v974_v42 = vadd.f32 %v973_v41, %v972_v39 }
 0x580   :  { %v975_v43 = vrot.slane %v974_v42, 2 }
 0x582   :  { %v976_v44 = vadd.f32 %v975_v43, %v974_v42 }
 0x584   :  { %v977_v45 = vrot.slane %v976_v44, 1 }
 0x586   :  { %v978_v46 = vadd.f32 %v977_v45, %v976_v44 }
 0x588   :  { %v979_v47 = vmul.f32 %v978_v46, %v1657_v7 }
 0x58a   :  { %v980_v48 = vadd.f32 1e-05, %v979_v47 }
 0x58c   :  { %1454 = vrsqrt.f32 %v980_v48  ;;  %vm987_vm3 = vweird.f32 %v980_v48 }
 0x592   :  { %v1455_v49 = vpop.eup %1454 }
 0x593   :  { %v982_v50 = vmul.f32 %v1455_v49, %v980_v48  ;;  %vm988_vm2 = vweird.f32 %v1455_v49 }
 0x594   :  { %vm989_vm4 = vmor %vm987_vm3, %vm988_vm2 }
 0x595   :  { %v983_v51 = vmul.f32 %v1455_v49, %v982_v50 }
 0x597   :  { %v984_v52 = vmul.f32 0.5, %v983_v51 }
 0x599   :  { %v985_v3 = vsub.f32 1.5, %v984_v52 }
 0x59b   :  { %v986_v53 = vmul.f32 %v1455_v49, %v985_v3 }
 0x59d   :  { %v990_v54 = vsel %vm989_vm4, %v1455_v49, %v986_v53 }
 0x59e   :  { %v991_v55 = vmul.f32 %v990_v54, %v971_v38 }
 0x5a0   :  { %v1009_v56 = vpack.c.bf16 %v991_v55, %v991_v55 }
 0x5a2   :  { %1068 = vmatmul.bf16.vlgmr.msra.gmra.mxu1 %v1009_v56 }
 0x61f   :  { %v1069_v7 = vpop.f32.mrf.mxu1 }
 0x620   :  { %v1070_v58 = vadd.f32 %v1435_v57, %v1069_v7 }
 0x622   :  { %1073 = vst [vmem:[#allocation8] sm:$0xff] %v1070_v58 }
 0x623   :  { %1084 = dma.vmem_to_hbm [thread:$0]  %s1080_s19, 128, %s1082_s22, [#allocation4]  }
 0x627   :  { %v1071_v59 = vpop.f32.mrf.mxu1 }
 0x628   :  { %1556 = dma.done.wait [#allocation4], 128  }
 0x629   :  { %1557 = vsyncadd [#allocation4], 4294967168 }
 0x62a   :  { %1089 = vsyncpa [#allocation3], 1 }
 0x62b   :  { %1090 = vsyncpa [#allocation6], 1 }
 0x62c   :  { %1091 = vsyncpa [#allocation4], 1 }

</bundles_post_ra>
